<compile_context>
chip_gen: v6e
topology: v6e:2x2x1
jax: 0.10.0
libtpu: 0.0.40
codegen_flags: <defaults>
</compile_context>

<pallas_src>
import jax
import jax.numpy as jnp
import numpy as np
from jax.experimental import pallas as pl
from jax.experimental.pallas import tpu as pltpu

_MAX_PATH_TILE = 16 * 1024  # swept range 8K-32K; ~2 MiB/step working set keeps v7x (64 MiB VMEM) safe


def _round_up(a: int, b: int) -> int:
    return (a + b - 1) // b * b


def _swap_kernel(coef_ref, wdisc_ref,
                 x_ref, p1_ref, p2_ref, p3_ref, p4_ref, p5_ref, p6_ref,
                 o_ref):
    # coef_ref : (n_fix, 7)   bond-exponent coefficients, columns = [x, phi1..phi6]
    # wdisc_ref: (n_fix, 1)   notional * swap-leg weight_i * P(0, tau_i)
    # *_ref    : (1, TILE)    one state variable for a tile of MC paths
    # o_ref    : (1, TILE)    swap value for those paths
    #
    # Exponent: 7 broadcast multiply-accumulates on the VPU (MXU stays idle on purpose:
    # a K=7, M=9 matmul is <1% MXU utilization and serializes on the result FIFO).
    expo = coef_ref[:, 0:1] * x_ref[...]
    expo = expo + coef_ref[:, 1:2] * p1_ref[...]
    expo = expo + coef_ref[:, 2:3] * p2_ref[...]
    expo = expo + coef_ref[:, 3:4] * p3_ref[...]
    expo = expo + coef_ref[:, 4:5] * p4_ref[...]
    expo = expo + coef_ref[:, 5:6] * p5_ref[...]
    expo = expo + coef_ref[:, 6:7] * p6_ref[...]
    zcb = jnp.exp(expo)                                            # (n_fix, TILE), EUP
    # Weighted reduce over fixings: VPU multiply + XLU sublane sum (no MXU).
    o_ref[...] = jnp.sum(wdisc_ref[...] * zcb, axis=0, keepdims=True)


def _ts_bond_coeffs(fixings, alpha0, alpha1, gamma):
    """Trolle-Schwartz (2009) zero-coupon-bond B-functions for each tau in `fixings`.

    log P(t,t+tau) = -varphi*tau + Bx*x + Bphi1*phi1 + ... + Bphi6*phi6   (B_v = 0)
    Returns C of shape (n_fix, 7), column order [x, phi1..phi6].
    """
    tau = fixings.astype(jnp.float32)
    e = jnp.exp(-gamma * tau)
    A = alpha0 / gamma + alpha1 / gamma**2
    B = alpha1 / gamma
    C1 = A * (1.0 - e) - B * tau * e          # int_t^T sigma_f(t,u) du
    C2 = B * (1.0 - e)
    Bx = -C1
    Bp1 = -C2
    Bp2 = -A * C1
    Bp3 = A * C1 - 0.5 * C1 * C1
    Bp4 = -A * C2
    Bp5 = A * C2 + B * C1 - C1 * C2
    Bp6 = B * C2 - 0.5 * C2 * C2
    return jnp.stack([Bx, Bp1, Bp2, Bp3, Bp4, Bp5, Bp6], axis=1)   # (n_fix, 7)


def swap_forward(X, const, fixings, delta, K, notional, simDim: int = 1):
    """Pallas implementation of the EuPayerSwptAAD swap-valuation forward pass."""
    # const = (kappa, theta, rho, sigma, alpha0, alpha1, gamma, varphi)
    # kappa/theta/rho/sigma only drive the SDE dynamics; the valuation does not use them.
    kappa, theta, rho, sigma, alpha0, alpha1, gamma, varphi = [jnp.float32(c) for c in const]
    del kappa, theta, rho, sigma

    # v (variance) does not enter the bond reconstitution (B_v = 0) -> not streamed.
    x, _v, p1, p2, p3, p4, p5, p6 = X
    # Bond exponent is additive across the simDim volatility factors (scalar constants),
    # so sum over simDim up front.  For simDim=1 this is just a cheap reshape.
    states = [
        jnp.asarray(s, jnp.float32).reshape(simDim, -1).sum(axis=0)[None, :]
        for s in (x, p1, p2, p3, p4, p5, p6)
    ]  # 7 arrays of shape (1, N)
    n_paths = states[0].shape[1]

    fixings = jnp.asarray(fixings, jnp.float32)
    n_fix = int(fixings.shape[0])
    coeffs = _ts_bond_coeffs(fixings, alpha0, alpha1, gamma)        # (n_fix, 7)

    # Payer-swap leg weights: float leg P[0]-P[-1], fixed leg -delta*K*sum(P[1:]).
    w = jnp.full((n_fix,), -jnp.float32(delta) * jnp.float32(K), jnp.float32)
    w = w.at[0].set(1.0)
    w = w.at[-1].add(-1.0)
    disc0 = jnp.exp(-varphi * fixings)                              # P(0, tau_i), flat fwd curve
    wdisc = (jnp.float32(notional) * w * disc0)[:, None]            # (n_fix, 1)

    # Path tiling: big lane-dense tiles; pad only the ragged tail (zero state -> exp(0)=1,
    # finite, sliced off below).
    tile = min(_MAX_PATH_TILE, _round_up(n_paths, 128))
    n_pad = _round_up(n_paths, tile)
    if n_pad != n_paths:
        states = [jnp.pad(s, ((0, 0), (0, n_pad - n_paths))) for s in states]

    grid = (n_pad // tile,)
    state_spec = pl.BlockSpec((1, tile), lambda i: (0, i))

    cost = pl.CostEstimate(
        flops=int(2 * 7 * n_fix * n_paths + 2 * n_fix * n_paths),
        transcendentals=int(n_fix * n_paths),
        bytes_accessed=int(4 * (7 * n_paths + n_paths) + 4 * n_fix * 8),
    )

    out = pl.pallas_call(
        _swap_kernel,
        out_shape=jax.ShapeDtypeStruct((1, n_pad), jnp.float32),
        grid_spec=pltpu.PrefetchScalarGridSpec(
            num_scalar_prefetch=0,
            grid=grid,
            in_specs=[
                pl.BlockSpec((n_fix, 7), lambda i: (0, 0)),   # coefficients (full array)
                pl.BlockSpec((n_fix, 1), lambda i: (0, 0)),   # weighted discounts (full array)
            ] + [state_spec] * 7,
            out_specs=pl.BlockSpec((1, tile), lambda i: (0, i)),
        ),
        compiler_params=pltpu.CompilerParams(dimension_semantics=("parallel",)),
        cost_estimate=cost,
    )(coeffs, wdisc, *states)

    return out[0, :n_paths]


def swap_reference(X, const, fixings, delta, K, notional, simDim: int = 1):
    """Pure-JAX reference of the same forward pass (correctness check)."""
    _, _, _, _, alpha0, alpha1, gamma, varphi = [jnp.float32(c) for c in const]
    x, _v, p1, p2, p3, p4, p5, p6 = X
    S = jnp.stack(
        [jnp.asarray(s, jnp.float32).reshape(simDim, -1).sum(axis=0)
         for s in (x, p1, p2, p3, p4, p5, p6)],
        axis=0,
    )  # (7, N)
    fixings = jnp.asarray(fixings, jnp.float32)
    C = _ts_bond_coeffs(fixings, alpha0, alpha1, gamma)
    expo = jnp.einsum("fj,jn->fn", C, S, precision=jax.lax.Precision.HIGHEST)
    zcb = jnp.exp(-varphi * fixings)[:, None] * jnp.exp(expo)       # (n_fix, N)
    fixed = jnp.float32(delta) * jnp.float32(K) * jnp.sum(zcb[1:], axis=0)
    return jnp.float32(notional) * (zcb[0] - zcb[-1] - fixed)


if __name__ == "__main__":
    key = jax.random.PRNGKey(0)
    simDim = 1

    # const = (kappa, theta, rho, sigma, alpha0, alpha1, gamma, varphi)
    const = (0.553, 0.7542, -0.1, 0.3325, 0.045, 0.131, 0.3341, 0.0832)

    # Swap: first fixing at 1y, 8 semi-annual accrual periods (delta = 0.5).
    fixings = 1.0 + 0.5 * jnp.arange(9, dtype=jnp.float32)
    delta = 0.5
    K = 0.05
    notional = 1.0e6

    def make_state(n_paths, k):
        ks = jax.random.split(k, 8)
        x = 0.02 * jax.random.normal(ks[0], (simDim, n_paths), jnp.float32)
        v = 0.10 + 0.05 * jnp.abs(jax.random.normal(ks[1], (simDim, n_paths), jnp.float32))
        phis = [0.01 * jax.random.normal(ks[2 + i], (simDim, n_paths), jnp.float32)
                for i in range(6)]
        return (x, v, *phis)

    # Case 1: small, lane-aligned path count.  Case 2: ragged path count (exercises padding).
    for n_paths, sub in ((256, 0), (300, 1)):
        X = make_state(n_paths, jax.random.fold_in(key, sub))
        out = swap_forward(X, const, fixings, delta, K, notional, simDim=simDim)
        out = jax.block_until_ready(out)
        ref = swap_reference(X, const, fixings, delta, K, notional, simDim=simDim)
        assert out.shape == (n_paths,)
        np.testing.assert_allclose(
            np.asarray(out), np.asarray(ref), rtol=2e-3,
            atol=1e-4 * float(jnp.max(jnp.abs(ref))),
        )

    print("KERNEL_OK")
</pallas_src>

<mosaic_0001>
module attributes {stable_mosaic.version = 11 : i64} {
  func.func @_swap_kernel(%arg0: i32, %arg1: memref<9x7xf32, #tpu.memory_space<vmem>>, %arg2: memref<9x1xf32, #tpu.memory_space<vmem>>, %arg3: memref<1x256xf32, #tpu.memory_space<vmem>>, %arg4: memref<1x256xf32, #tpu.memory_space<vmem>>, %arg5: memref<1x256xf32, #tpu.memory_space<vmem>>, %arg6: memref<1x256xf32, #tpu.memory_space<vmem>>, %arg7: memref<1x256xf32, #tpu.memory_space<vmem>>, %arg8: memref<1x256xf32, #tpu.memory_space<vmem>>, %arg9: memref<1x256xf32, #tpu.memory_space<vmem>>, %arg10: memref<1x256xf32, #tpu.memory_space<vmem>>) attributes {dimension_semantics = [#tpu.dimension_semantics<parallel>], iteration_bounds = array<i64: 1>, scalar_prefetch = 0 : i64, scratch_operands = 0 : i64, tpu.core_type = #tpu.core_type<tc>, window_params = [{pipeline_mode = #tpu.pipeline_mode<synchronous>, transform_indices = @transform_0, window_bounds = array<i64: 9, 7>}, {pipeline_mode = #tpu.pipeline_mode<synchronous>, transform_indices = @transform_1, window_bounds = array<i64: 9, 1>}, {transform_indices = @transform_2, window_bounds = array<i64: 1, 256>}, {transform_indices = @transform_3, window_bounds = array<i64: 1, 256>}, {transform_indices = @transform_4, window_bounds = array<i64: 1, 256>}, {transform_indices = @transform_5, window_bounds = array<i64: 1, 256>}, {transform_indices = @transform_6, window_bounds = array<i64: 1, 256>}, {transform_indices = @transform_7, window_bounds = array<i64: 1, 256>}, {transform_indices = @transform_8, window_bounds = array<i64: 1, 256>}, {transform_indices = @transform_9, window_bounds = array<i64: 1, 256>}]} {
    %c0 = arith.constant 0 : index
    %c0_0 = arith.constant 0 : index
    %0 = vector.load %arg1[%c0, %c0_0] : memref<9x7xf32, #tpu.memory_space<vmem>>, vector<9x1xf32>
    %c0_1 = arith.constant 0 : index
    %c0_2 = arith.constant 0 : index
    %1 = vector.load %arg3[%c0_1, %c0_2] : memref<1x256xf32, #tpu.memory_space<vmem>>, vector<1x256xf32>
    %2 = vector.broadcast %0 : vector<9x1xf32> to vector<9x256xf32>
    %3 = vector.broadcast %1 : vector<1x256xf32> to vector<9x256xf32>
    %4 = arith.mulf %2, %3 : vector<9x256xf32>
    %c0_3 = arith.constant 0 : index
    %c1 = arith.constant 1 : index
    %5 = vector.load %arg1[%c0_3, %c1] : memref<9x7xf32, #tpu.memory_space<vmem>>, vector<9x1xf32>
    %c0_4 = arith.constant 0 : index
    %c0_5 = arith.constant 0 : index
    %6 = vector.load %arg4[%c0_4, %c0_5] : memref<1x256xf32, #tpu.memory_space<vmem>>, vector<1x256xf32>
    %7 = vector.broadcast %5 : vector<9x1xf32> to vector<9x256xf32>
    %8 = vector.broadcast %6 : vector<1x256xf32> to vector<9x256xf32>
    %9 = arith.mulf %7, %8 : vector<9x256xf32>
    %10 = arith.addf %4, %9 : vector<9x256xf32>
    %c0_6 = arith.constant 0 : index
    %c2 = arith.constant 2 : index
    %11 = vector.load %arg1[%c0_6, %c2] : memref<9x7xf32, #tpu.memory_space<vmem>>, vector<9x1xf32>
    %c0_7 = arith.constant 0 : index
    %c0_8 = arith.constant 0 : index
    %12 = vector.load %arg5[%c0_7, %c0_8] : memref<1x256xf32, #tpu.memory_space<vmem>>, vector<1x256xf32>
    %13 = vector.broadcast %11 : vector<9x1xf32> to vector<9x256xf32>
    %14 = vector.broadcast %12 : vector<1x256xf32> to vector<9x256xf32>
    %15 = arith.mulf %13, %14 : vector<9x256xf32>
    %16 = arith.addf %10, %15 : vector<9x256xf32>
    %c0_9 = arith.constant 0 : index
    %c3 = arith.constant 3 : index
    %17 = vector.load %arg1[%c0_9, %c3] : memref<9x7xf32, #tpu.memory_space<vmem>>, vector<9x1xf32>
    %c0_10 = arith.constant 0 : index
    %c0_11 = arith.constant 0 : index
    %18 = vector.load %arg6[%c0_10, %c0_11] : memref<1x256xf32, #tpu.memory_space<vmem>>, vector<1x256xf32>
    %19 = vector.broadcast %17 : vector<9x1xf32> to vector<9x256xf32>
    %20 = vector.broadcast %18 : vector<1x256xf32> to vector<9x256xf32>
    %21 = arith.mulf %19, %20 : vector<9x256xf32>
    %22 = arith.addf %16, %21 : vector<9x256xf32>
    %c0_12 = arith.constant 0 : index
    %c4 = arith.constant 4 : index
    %23 = vector.load %arg1[%c0_12, %c4] : memref<9x7xf32, #tpu.memory_space<vmem>>, vector<9x1xf32>
    %c0_13 = arith.constant 0 : index
    %c0_14 = arith.constant 0 : index
    %24 = vector.load %arg7[%c0_13, %c0_14] : memref<1x256xf32, #tpu.memory_space<vmem>>, vector<1x256xf32>
    %25 = vector.broadcast %23 : vector<9x1xf32> to vector<9x256xf32>
    %26 = vector.broadcast %24 : vector<1x256xf32> to vector<9x256xf32>
    %27 = arith.mulf %25, %26 : vector<9x256xf32>
    %28 = arith.addf %22, %27 : vector<9x256xf32>
    %c0_15 = arith.constant 0 : index
    %c5 = arith.constant 5 : index
    %29 = vector.load %arg1[%c0_15, %c5] : memref<9x7xf32, #tpu.memory_space<vmem>>, vector<9x1xf32>
    %c0_16 = arith.constant 0 : index
    %c0_17 = arith.constant 0 : index
    %30 = vector.load %arg8[%c0_16, %c0_17] : memref<1x256xf32, #tpu.memory_space<vmem>>, vector<1x256xf32>
    %31 = vector.broadcast %29 : vector<9x1xf32> to vector<9x256xf32>
    %32 = vector.broadcast %30 : vector<1x256xf32> to vector<9x256xf32>
    %33 = arith.mulf %31, %32 : vector<9x256xf32>
    %34 = arith.addf %28, %33 : vector<9x256xf32>
    %c0_18 = arith.constant 0 : index
    %c6 = arith.constant 6 : index
    %35 = vector.load %arg1[%c0_18, %c6] : memref<9x7xf32, #tpu.memory_space<vmem>>, vector<9x1xf32>
    %c0_19 = arith.constant 0 : index
    %c0_20 = arith.constant 0 : index
    %36 = vector.load %arg9[%c0_19, %c0_20] : memref<1x256xf32, #tpu.memory_space<vmem>>, vector<1x256xf32>
    %37 = vector.broadcast %35 : vector<9x1xf32> to vector<9x256xf32>
    %38 = vector.broadcast %36 : vector<1x256xf32> to vector<9x256xf32>
    %39 = arith.mulf %37, %38 : vector<9x256xf32>
    %40 = arith.addf %34, %39 : vector<9x256xf32>
    %41 = math.exp %40 : vector<9x256xf32>
    %c0_21 = arith.constant 0 : index
    %c0_22 = arith.constant 0 : index
    %42 = vector.load %arg2[%c0_21, %c0_22] : memref<9x1xf32, #tpu.memory_space<vmem>>, vector<9x1xf32>
    %43 = vector.broadcast %42 : vector<9x1xf32> to vector<9x256xf32>
    %44 = arith.mulf %43, %41 : vector<9x256xf32>
    %cst = arith.constant dense<0.000000e+00> : vector<256xf32>
    %45 = vector.multi_reduction <add>, %44, %cst [0] : vector<9x256xf32> to vector<256xf32>
    %46 = vector.shape_cast %45 : vector<256xf32> to vector<1x256xf32>
    %c0_23 = arith.constant 0 : index
    %c0_24 = arith.constant 0 : index
    %47 = vector.load %arg10[%c0_23, %c0_24] : memref<1x256xf32, #tpu.memory_space<vmem>>, vector<1x256xf32>
    tpu.vector_store %arg10[%c0_23, %c0_24], %46 {strides = array<i32>} : memref<1x256xf32, #tpu.memory_space<vmem>>, vector<1x256xf32>,
    return
  }
  func.func @transform_0(%arg0: i32) -> (i32, i32) {
    %c0_i32 = arith.constant 0 : i32
    %c0_i32_0 = arith.constant 0 : i32
    %c0_i32_1 = arith.constant 0 : i32
    return %c0_i32, %c0_i32_0 : i32, i32
  }
  func.func @transform_1(%arg0: i32) -> (i32, i32) {
    %c0_i32 = arith.constant 0 : i32
    %c0_i32_0 = arith.constant 0 : i32
    %c0_i32_1 = arith.constant 0 : i32
    return %c0_i32, %c0_i32_0 : i32, i32
  }
  func.func @transform_2(%arg0: i32) -> (i32, i32) {
    %c0_i32 = arith.constant 0 : i32
    %c0_i32_0 = arith.constant 0 : i32
    return %c0_i32, %arg0 : i32, i32
  }
  func.func @transform_3(%arg0: i32) -> (i32, i32) {
    %c0_i32 = arith.constant 0 : i32
    %c0_i32_0 = arith.constant 0 : i32
    return %c0_i32, %arg0 : i32, i32
  }
  func.func @transform_4(%arg0: i32) -> (i32, i32) {
    %c0_i32 = arith.constant 0 : i32
    %c0_i32_0 = arith.constant 0 : i32
    return %c0_i32, %arg0 : i32, i32
  }
  func.func @transform_5(%arg0: i32) -> (i32, i32) {
    %c0_i32 = arith.constant 0 : i32
    %c0_i32_0 = arith.constant 0 : i32
    return %c0_i32, %arg0 : i32, i32
  }
  func.func @transform_6(%arg0: i32) -> (i32, i32) {
    %c0_i32 = arith.constant 0 : i32
    %c0_i32_0 = arith.constant 0 : i32
    return %c0_i32, %arg0 : i32, i32
  }
  func.func @transform_7(%arg0: i32) -> (i32, i32) {
    %c0_i32 = arith.constant 0 : i32
    %c0_i32_0 = arith.constant 0 : i32
    return %c0_i32, %arg0 : i32, i32
  }
  func.func @transform_8(%arg0: i32) -> (i32, i32) {
    %c0_i32 = arith.constant 0 : i32
    %c0_i32_0 = arith.constant 0 : i32
    return %c0_i32, %arg0 : i32, i32
  }
  func.func @transform_9(%arg0: i32) -> (i32, i32) {
    %c0_i32 = arith.constant 0 : i32
    %c0_i32_0 = arith.constant 0 : i32
    return %c0_i32, %arg0 : i32, i32
  }
}

</mosaic_0001>

<bundles_post_ra>
// kernel: tpu_custom_call.1
= control target key start
LH: loop header
LB: loop body
LE: loop exit
PB: predicated region body
PF: predicated region fallthrough
CT: control target
= control target key end

     0   :  { %v360_v2 = vmov 0   ;;  %s462_s0 = inlined_call_operand.vmem [shape: f32[9,7], index: 0, kind: input, shape index: {}]   ;;  %s463_s1 = inlined_call_operand.vmem [shape: f32[9,1], index: 1, kind: input, shape index: {}]   ;;  %s464_s2 = inlined_call_operand.vmem [shape: f32[1,256], index: 2, kind: input, shape index: {}]   ;;  %s465_s3 = inlined_call_operand.vmem [shape: f32[1,256], index: 3, kind: input, shape index: {}]   ;;  %s466_s4 = inlined_call_operand.vmem [shape: f32[1,256], index: 4, kind: input, shape index: {}]   ;;  %s467_s5 = inlined_call_operand.vmem [shape: f32[1,256], index: 5, kind: input, shape index: {}]   ;;  %s468_s6 = inlined_call_operand.vmem [shape: f32[1,256], index: 6, kind: input, shape index: {}]   ;;  %s469_s7 = inlined_call_operand.vmem [shape: f32[1,256], index: 7, kind: input, shape index: {}]   ;;  %s470_s8 = inlined_call_operand.vmem [shape: f32[1,256], index: 8, kind: input, shape index: {}]   ;;  %s471_s9 = inlined_call_operand.hbm [shape: f32[1,256], index: 9, kind: output, shape index: {}]  }
   0x1   :  { %v34_v0 = vld [vmem:[%s462_s0 + $0x8] sm:$0x1]  ;;  %v33_v1 = vld [vmem:[%s462_s0] sm:$0xff]  ;;  %318 = vset.pattern.permute.xlu1 %v360_v2  ;;  %316 = vset.pattern.permute.xlu0 %v360_v2 }
   0x2   :  { %43 = vperm.xlu0 %316, %v34_v0   ;;  %38 = vperm.xlu1 %318, %v33_v1  }
   0x3   :  { %14 = vsyncpa [#allocation3], 0  ;;  %v361_v3 = vmov 1   ;;  %v362_v4 = vmov 2   ;;  %v363_v5 = vmov 3   ;;  %v364_v6 = vmov 4  }
   0x4   :  { %v365_v7 = vmov 5   ;;  %v238_v8 = vld [vmem:[%s463_s1 + $0x8] sm:$0x1]  ;;  %v366_v9 = vmov 6   ;;  %v237_v10 = vld [vmem:[%s463_s1] sm:$0xff]  ;;  %v47_v12 = vlaneseq  ;;  %vm253_vm0 = vcmask 1040384  }
   0x5   :  { %v35_v19 = vld [vmem:[%s464_s2] sm:$0x3] }
   0x6   :  { %317 = vset.pattern.permute.xlu0 %v361_v3  ;;  %319 = vset.pattern.permute.xlu1 %v361_v3  ;;  %v432_v14 = vshrl.u32 %v47_v12, 7  ;;  %v61_v20 = vld [vmem:[%s465_s3] sm:$0x3]  ;;  %vm290_vm1 = vcmp.lt.s32.totalorder %v47_v12, 256 }
   0x7   :  { %67 = vperm.xlu0 %317, %v34_v0   ;;  %63 = vperm.xlu1 %319, %v33_v1   ;;  %v89_v21 = vld [vmem:[%s466_s4] sm:$0x3] }
   0x8   :  { %v49_v17 = vsub.s32 0, %v432_v14  ;;  %v53_v18 = vsub.s32 1, %v432_v14  ;;  %v117_v30 = vld [vmem:[%s467_s5] sm:$0x3] }
   0x9   :  { %v145_v39 = vld [vmem:[%s468_s6] sm:$0x3] }
   0xa   :  { %v50_v24 = vrot.slane %v35_v19, %v49_v17  ;;  %v54_v25 = vrot.slane %v35_v19, %v53_v18  ;;  %v74_v26 = vrot.slane %v61_v20, %v49_v17  ;;  %v78_v27 = vrot.slane %v61_v20, %v53_v18  ;;  %v173_v47 = vld [vmem:[%s469_s7] sm:$0x3]  ;;  %s368_s7 = smov [#allocation2]  }
   0xb   :  { %321 = vset.pattern.permute.xlu0 %v362_v4  ;;  %320 = vset.pattern.permute.xlu1 %v362_v4  ;;  %v102_v28 = vrot.slane %v89_v21, %v49_v17  ;;  %v106_v29 = vrot.slane %v89_v21, %v53_v18  ;;  %v130_v36 = vrot.slane %v117_v30, %v49_v17 }
   0xc   :  { %91 = vperm.xlu0 %321, %v33_v1   ;;  %95 = vperm.xlu1 %320, %v34_v0   ;;  %v134_v37 = vrot.slane %v117_v30, %v53_v18  ;;  %v158_v50 = vrot.slane %v145_v39, %v49_v17  ;;  %v162_v51 = vrot.slane %v145_v39, %v53_v18 }
   0xd   :  { %v186_v59 = vrot.slane %v173_v47, %v49_v17  ;;  %v190_v60 = vrot.slane %v173_v47, %v53_v18 }
  0x10   :  { %322 = vset.pattern.permute.xlu1 %v363_v5  ;;  %323 = vset.pattern.permute.xlu0 %v364_v6 }
  0x11   :  { %123 = vperm.xlu1 %322, %v34_v0   ;;  %151 = vperm.xlu0 %323, %v34_v0  }
  0x15   :  { %119 = vperm.xlu1 %322, %v33_v1   ;;  %326 = vset.pattern.permute.xlu0 %v365_v7 }
  0x16   :  { %175 = vperm.xlu0 %326, %v33_v1  }
  0x19   :  { %324 = vset.pattern.permute.xlu1 %v364_v6 }
  0x1a   :  { %147 = vperm.xlu1 %324, %v33_v1   ;;  %328 = vset.pattern.permute.xlu0 %v360_v2 }
  0x1b   :  { %246 = vperm.xlu0 %328, %v238_v8  }
  0x1e   :  { %325 = vset.pattern.permute.xlu1 %v365_v7 }
  0x1f   :  { %179 = vperm.xlu1 %325, %v34_v0  }
  0x23   :  { %327 = vset.pattern.permute.xlu1 %v366_v9 }
  0x24   :  { %207 = vperm.xlu1 %327, %v34_v0  }
  0x28   :  { %203 = vperm.xlu1 %327, %v33_v1   ;;  %v201_v1 = vld [vmem:[%s470_s8] sm:$0x3]  ;;  %s299_s8 = sshll.u32 %s368_s7, 4  ;;  %s300_s8 = int_to_ptr.vmem [resolvable:$true] %s299_s8 }
  0x29   :  { %v218_v19 = vrot.slane %v201_v1, %v53_v18  ;;  %s338_s24 = scalar_lea.vmem %s300_s8, 32  ;;  %p343_p1 = scmp.lt.s32.totalorder %s300_s8, %s300_s8 }
  0x2a   :  { %p339_p0 = scmp.ne.s32.totalorder %s300_s8, %s338_s24  ;;  %p344_p2 = scmp.lt.s32.totalorder %s338_s24, %s338_s24 }
  0x2c   :  { %329 = vset.pattern.permute.xlu1 %v360_v2  ;;  %p345_p3 = por %p344_p2, %p343_p1 }
  0x2d   :  { %241 = vperm.xlu1 %329, %v237_v10  }
  0x2e   :  { %p346_p4 = pnand %p345_p3, %p339_p0 }
  0x7d   :  { %v39_v11 = vpop.permute.xlu1 %38  ;;  %v44_v15 = vpop.permute.xlu0 %43 }
  0x7e   :  { %v59_v31 = vmul.f32 %v50_v24, %v44_v15  ;;  %v60_v32 = vmul.f32 %v54_v25, %v44_v15  ;;  %v57_v52 = vmul.f32 %v50_v24, %v39_v11  ;;  %v58_v53 = vmul.f32 %v54_v25, %v39_v11 }
  0x82   :  { %v64_v13 = vpop.permute.xlu1 %63  ;;  %v68_v23 = vpop.permute.xlu0 %67 }
  0x83   :  { %v83_v33 = vmul.f32 %v74_v26, %v68_v23  ;;  %v84_v34 = vmul.f32 %v78_v27, %v68_v23  ;;  %v81_v44 = vmul.f32 %v74_v26, %v64_v13  ;;  %v82_v45 = vmul.f32 %v78_v27, %v64_v13 }
  0x85   :  { %v87_v40 = vadd.f32 %v83_v33, %v59_v31  ;;  %v88_v41 = vadd.f32 %v84_v34, %v60_v32  ;;  %v85_v61 = vadd.f32 %v81_v44, %v57_v52  ;;  %v86_v62 = vadd.f32 %v82_v45, %v58_v53 }
  0x87   :  { %v96_v16 = vpop.permute.xlu1 %95  ;;  %v92_v38 = vpop.permute.xlu0 %91 }
  0x88   :  { %v111_v42 = vmul.f32 %v102_v28, %v96_v16  ;;  %v112_v43 = vmul.f32 %v106_v29, %v96_v16  ;;  %v109_v54 = vmul.f32 %v102_v28, %v92_v38  ;;  %v110_v55 = vmul.f32 %v106_v29, %v92_v38 }
  0x89   :  { %v214_v16 = vrot.slane %v201_v1, %v49_v17 }
  0x8a   :  { %v115_v57 = vadd.f32 %v111_v42, %v87_v40  ;;  %v116_v58 = vadd.f32 %v112_v43, %v88_v41  ;;  %v113_v7 = vadd.f32 %v109_v54, %v85_v61  ;;  %v114_v8 = vadd.f32 %v110_v55, %v86_v62 }
  0x8b   :  { %v367_v62 = vmov 1966171168  }
  0x8c   :  { %v124_v22 = vpop.permute.xlu1 %123  ;;  %v152_v56 = vpop.permute.xlu0 %151 }
  0x8d   :  { %v139_v48 = vmul.f32 %v130_v36, %v124_v22  ;;  %v140_v49 = vmul.f32 %v134_v37, %v124_v22  ;;  %v167_v4 = vmul.f32 %v158_v50, %v152_v56  ;;  %v168_v5 = vmul.f32 %v162_v51, %v152_v56 }
  0x8f   :  { %v143_v2 = vadd.f32 %v139_v48, %v115_v57  ;;  %v144_v3 = vadd.f32 %v140_v49, %v116_v58 }
  0x90   :  { %v120_v35 = vpop.permute.xlu1 %119 }
  0x91   :  { %v137_v63 = vmul.f32 %v130_v36, %v120_v35  ;;  %v138_v0 = vmul.f32 %v134_v37, %v120_v35  ;;  %v176_v11 = vpop.permute.xlu0 %175  ;;  %v171_v22 = vadd.f32 %v167_v4, %v143_v2  ;;  %v172_v23 = vadd.f32 %v168_v5, %v144_v3 }
  0x92   :  { %v193_v26 = vmul.f32 %v186_v59, %v176_v11  ;;  %v194_v27 = vmul.f32 %v190_v60, %v176_v11 }
  0x93   :  { %v141_v20 = vadd.f32 %v137_v63, %v113_v7  ;;  %v142_v21 = vadd.f32 %v138_v0, %v114_v8  ;;  %v274_v63 = vunpack.c.l.s4 %v367_v62 }
  0x95   :  { %v148_v46 = vpop.permute.xlu1 %147  ;;  %v275_v4 = vunpack.c.0.s8 %v274_v63 }
  0x96   :  { %v165_v9 = vmul.f32 %v158_v50, %v148_v46  ;;  %v166_v10 = vmul.f32 %v162_v51, %v148_v46  ;;  %v247_v44 = vpop.permute.xlu0 %246 }
  0x98   :  { %v169_v24 = vadd.f32 %v165_v9, %v141_v20  ;;  %v170_v25 = vadd.f32 %v166_v10, %v142_v21  ;;  %v278_v9 = vsub.s32 %v275_v4, %v432_v14 }
  0x9a   :  { %v180_v6 = vpop.permute.xlu1 %179  ;;  %v197_v35 = vadd.f32 %v193_v26, %v169_v24  ;;  %v198_v36 = vadd.f32 %v194_v27, %v170_v25 }
  0x9b   :  { %v195_v13 = vmul.f32 %v186_v59, %v180_v6  ;;  %v196_v15 = vmul.f32 %v190_v60, %v180_v6 }
  0x9d   :  { %v199_v29 = vadd.f32 %v195_v13, %v171_v22  ;;  %v200_v30 = vadd.f32 %v196_v15, %v172_v23 }
  0x9f   :  { %v208_v28 = vpop.permute.xlu1 %207 }
  0xa0   :  { %v223_v31 = vmul.f32 %v214_v16, %v208_v28  ;;  %v224_v32 = vmul.f32 %v218_v19, %v208_v28 }
  0xa2   :  { %v227_v33 = vadd.f32 %v223_v31, %v199_v29  ;;  %v228_v34 = vadd.f32 %v224_v32, %v200_v30 }
  0xa3   :  { %v204_v37 = vpop.permute.xlu1 %203 }
  0xa4   :  { %v233_v17 = vmul.f32 1.442695, %v227_v33  ;;  %v235_v18 = vmul.f32 1.442695, %v228_v34  ;;  %v221_v38 = vmul.f32 %v214_v16, %v204_v37  ;;  %v222_v39 = vmul.f32 %v218_v19, %v204_v37 }
  0xa6   :  { %330 = vpow2.f32 %v233_v17  ;;  %v225_v40 = vadd.f32 %v221_v38, %v197_v35  ;;  %v226_v41 = vadd.f32 %v222_v39, %v198_v36 }
  0xa7   :  { %332 = vpow2.f32 %v235_v18 }
  0xa8   :  { %v229_v42 = vmul.f32 1.442695, %v225_v40  ;;  %v231_v43 = vmul.f32 1.442695, %v226_v41  ;;  %v242_v48 = vpop.permute.xlu1 %241 }
  0xaa   :  { %334 = vpow2.f32 %v229_v42 }
  0xab   :  { %336 = vpow2.f32 %v231_v43 }
  0xb3   :  { %v331_v45 = vpop.eup %330 }
  0xb4   :  { %v333_v46 = vpop.eup %332  ;;  %v251_v47 = vmul.f32 %v331_v45, %v247_v44 }
  0xb5   :  { %v252_v49 = vmul.f32 %v333_v46, %v247_v44 }
  0xb6   :  { %v254_v53 = vsel %vm253_vm0, %v251_v47, 0.0 }
  0xb7   :  { %v335_v50 = vpop.eup %334  ;;  %v262_v55 = vsel %vm253_vm0, %v252_v49, 0.0 }
  0xb8   :  { %v337_v51 = vpop.eup %336  ;;  %v249_v52 = vmul.f32 %v335_v50, %v242_v48 }
  0xb9   :  { %v250_v54 = vmul.f32 %v337_v51, %v242_v48 }
  0xba   :  { %v255_v56 = vadd.f32 %v254_v53, %v249_v52 }
  0xbb   :  { %v263_v57 = vadd.f32 %v262_v55, %v250_v54 }
  0xbc   :  { %v256_v58 = vrot.slane %v255_v56, 4 }
  0xbd   :  { %v264_v59 = vrot.slane %v263_v57, 4 }
  0xbe   :  { %v257_v60 = vadd.f32 %v256_v58, %v255_v56 }
  0xbf   :  { %v265_v61 = vadd.f32 %v264_v59, %v263_v57 }
  0xc0   :  { %v258_v0 = vrot.slane %v257_v60, 2 }
  0xc1   :  { %v266_v1 = vrot.slane %v265_v61, 2 }
  0xc2   :  { %v259_v2 = vadd.f32 %v258_v0, %v257_v60 }
  0xc3   :  { %v267_v3 = vadd.f32 %v266_v1, %v265_v61 }
  0xc4   :  { %v260_v5 = vrot.slane %v259_v2, 1 }
  0xc5   :  { %v268_v6 = vrot.slane %v267_v3, 1 }
  0xc6   :  { %v261_v7 = vadd.f32 %v260_v5, %v259_v2 }
  0xc7   :  { %v269_v8 = vadd.f32 %v268_v6, %v267_v3 }
  0xc9   :  { %v272_v10 = vcombine.low %v261_v7, %v269_v8 }
  0xcb   :  { %v279_v11 = vrot.slane %v272_v10, %v278_v9 }
  0xcd   :  { %v286_v13 = vrot.slane %v279_v11, %v278_v9 }
  0xcf   :  { %292 = vst.msk [vmem:[#allocation2] sm:$0x3] %vm290_vm1, %v286_v13 }
  0xd0   :  { %349 = shalt.err (!%p346_p4)
}
  0xd1   :  { %302 = dma.vmem_to_hbm [thread:$0]  %s300_s8, 32, %s471_s9, [#allocation3]  }
  0xd2   :  { %358 = dma.done.wait [#allocation3], 32  }
  0xd3   :  { %359 = vsyncadd [#allocation3], 4294967264 }
  0xd4   :  { %306 = vsyncpa [#allocation3], 1 }

</bundles_post_ra>
